<compile_context>
chip_gen: v6e
topology: v6e:2x2x1
jax: 0.10.0
libtpu: 0.0.40
codegen_flags: <defaults>
</compile_context>

<pallas_src>
import functools

import jax
import jax.numpy as jnp
from jax.experimental import pallas as pl
from jax.experimental.pallas import tpu as pltpu


def _ln4d_plain_kernel(x_ref, g_ref, b_ref, o_ref, *, eps):
    """Block = (1, C, tile): reduce over the sublane (channel) axis."""
    x = x_ref[...].astype(jnp.float32)                 # (1, C, tile)
    mu = jnp.mean(x, axis=1, keepdims=True)            # (1, 1, tile)
    xc = x - mu                                        # bound once, reused below
    var = jnp.mean(xc * xc, axis=1, keepdims=True)     # unbiased=False
    inv_std = jax.lax.rsqrt(var + eps)                 # eps inside the sqrt (matches module)
    y = xc * inv_std * g_ref[...] + b_ref[...]         # g/b: (C, 1) broadcast
    o_ref[...] = y.astype(o_ref.dtype)


def _ln4d_folded_kernel(x_ref, a_ref, g_ref, b_ref, o_ref, *, inv_c, eps):
    """Block = (1, G*C, tile): G batch items folded into the sublane axis.

    a_ref is the (rows, rows) 0/1 group-indicator matrix; a single tiny MXU matmul
    both reduces over each group's C channels and broadcasts the statistic back to
    every row (no in-kernel reshape / cross-sublane relayout needed).  The matmul is
    negligible work and hides entirely under the HBM DMA.
    """
    x = x_ref[0].astype(jnp.float32)                   # (rows, tile)
    a = a_ref[...]                                     # (rows, rows) exact 0/1
    mu = jnp.dot(a, x, precision=jax.lax.Precision.HIGHEST,
                 preferred_element_type=jnp.float32) * inv_c
    xc = x - mu
    var = jnp.dot(a, xc * xc, precision=jax.lax.Precision.HIGHEST,
                  preferred_element_type=jnp.float32) * inv_c
    inv_std = jax.lax.rsqrt(var + eps)
    y = xc * inv_std * g_ref[...] + b_ref[...]         # g/b: (rows, 1) broadcast
    o_ref[...] = y[None].astype(o_ref.dtype)


def _pick_fold(batch, chans, itemsize):
    """Smallest G dividing batch so G*C fills the sublane tiling for this dtype."""
    sub = max(8, 32 // itemsize)          # 8 rows for f32, 16 for bf16, 32 for int8
    if chans % sub == 0:
        return 1                          # already sublane-dense, no fold needed
    for g in range(2, batch + 1):
        if batch % g == 0 and (g * chans) % sub == 0 and g * chans <= 64:
            return g
    return 1                              # no clean fold -> plain path (padded sublanes)


def layer_normalization_4d(x, gamma, beta, eps=1e-5):
    """x: (B, C, H, W); gamma/beta: (1, C, 1, 1). Matches PyTorch LayerNormalization4D."""
    B, C, H, W = x.shape
    S = H * W
    eps = float(eps)
    itemsize = jnp.dtype(x.dtype).itemsize

    # --- sublane fold: view (B, C, S) as (B//G, G*C, S) so DMA blocks are sublane-dense ---
    G = _pick_fold(B, C, itemsize)
    rows = G * C
    n_b = B // G
    x3 = x.reshape(n_b, rows, S)                                      # contiguous -> free view
    g2 = jnp.tile(gamma.reshape(C, 1).astype(jnp.float32), (G, 1))    # (rows, 1)
    b2 = jnp.tile(beta.reshape(C, 1).astype(jnp.float32), (G, 1))     # (rows, 1)

    # --- spatial tile: lane-dense, sized by bytes (~2 MiB of f32 working data per block) ---
    target_f32_block = 2 * 1024 * 1024
    tile = max(128, (target_f32_block // (rows * 4)) // 128 * 128)
    if tile >= S:
        tile = S                          # one full-extent S block (exempt from the 128 rule)
    n_s = pl.cdiv(S, tile)                # ragged S -> Pallas partial edge block, no host pad
    # v7x megacore: keep >=2 parallel grid steps when there is enough work for two cores.
    if n_b * n_s < 2 and S >= 256:
        tile = max(128, ((S + 1) // 2) // 128 * 128)
        n_s = pl.cdiv(S, tile)

    # --- VMEM budget: double-buffered in/out blocks + ~5 f32 temporaries + params + slack ---
    io_block = rows * tile * itemsize
    f32_block = rows * tile * 4
    need = 4 * io_block + 5 * f32_block + 4 * rows * rows + 8 * rows + (64 << 10)
    vmem_limit = int(min(56 << 20, max(4 << 20, need * 3 // 2)))

    # --- advisory cost estimate with *real* DMA bytes (sublane + edge-lane padding) ---
    sub = max(8, 32 // itemsize)
    rows_eff = -(-rows // sub) * sub      # HBM tiled layout pads the sublane dim
    s_eff = n_s * tile                    # lane padding of the partial edge block
    flops = 10 * n_b * rows * s_eff + (4 * rows * rows * s_eff * n_b if G > 1 else 0)
    cost = pl.CostEstimate(
        flops=int(flops),
        transcendentals=int(n_b * rows * s_eff),
        bytes_accessed=int(2 * n_b * rows_eff * s_eff * itemsize + 4 * (rows * rows + 2 * rows)),
    )

    if G == 1:
        kernel = functools.partial(_ln4d_plain_kernel, eps=eps)
        in_specs = [
            pl.BlockSpec((1, rows, tile), lambda b, s: (b, 0, s)),
            pl.BlockSpec((rows, 1), lambda b, s: (0, 0)),
            pl.BlockSpec((rows, 1), lambda b, s: (0, 0)),
        ]
        operands = (x3, g2, b2)
    else:
        grp = jnp.arange(rows, dtype=jnp.int32) // C
        amat = (grp[:, None] == grp[None, :]).astype(jnp.float32)     # (rows, rows) 0/1
        kernel = functools.partial(_ln4d_folded_kernel, inv_c=1.0 / C, eps=eps)
        in_specs = [
            pl.BlockSpec((1, rows, tile), lambda b, s: (b, 0, s)),
            pl.BlockSpec((rows, rows), lambda b, s: (0, 0)),
            pl.BlockSpec((rows, 1), lambda b, s: (0, 0)),
            pl.BlockSpec((rows, 1), lambda b, s: (0, 0)),
        ]
        operands = (x3, amat, g2, b2)

    out = pl.pallas_call(
        kernel,
        out_shape=jax.ShapeDtypeStruct((n_b, rows, S), x.dtype),
        grid_spec=pltpu.PrefetchScalarGridSpec(
            num_scalar_prefetch=0,
            grid=(n_b, n_s),
            in_specs=in_specs,
            out_specs=pl.BlockSpec((1, rows, tile), lambda b, s: (b, 0, s)),
        ),
        compiler_params=pltpu.CompilerParams(
            dimension_semantics=("parallel", "parallel"),
            vmem_limit_bytes=vmem_limit,
        ),
        cost_estimate=cost,
    )(*operands)

    return out.reshape(B, C, H, W)


def _reference(x, gamma, beta, eps):
    mu = jnp.mean(x, axis=1, keepdims=True)
    var = jnp.mean((x - mu) ** 2, axis=1, keepdims=True)
    return (x - mu) / jnp.sqrt(var + eps) * gamma + beta


if __name__ == "__main__":
    key = jax.random.PRNGKey(0)
    B, C, H, W = 2, 4, 16, 16
    x = jax.random.normal(key, (B, C, H, W), dtype=jnp.float32)

    # Parameters exactly as in the PyTorch module __init__: gamma = ones, beta = zeros.
    gamma = jnp.ones((1, C, 1, 1), dtype=jnp.float32)
    beta = jnp.zeros((1, C, 1, 1), dtype=jnp.float32)

    y = jax.block_until_ready(layer_normalization_4d(x, gamma, beta, eps=1e-5))
    ref = _reference(x, gamma, beta, 1e-5)
    assert jnp.allclose(y, ref, atol=1e-5, rtol=1e-5), "mismatch vs reference (folded path)"

    # Ragged spatial extent (H*W = 196, not a multiple of 128) and non-trivial affine params.
    k1, k2, k3 = jax.random.split(jax.random.PRNGKey(1), 3)
    g_r = jax.random.normal(k2, (1, C, 1, 1), dtype=jnp.float32)
    b_r = jax.random.normal(k3, (1, C, 1, 1), dtype=jnp.float32)
    x2 = jax.random.normal(k1, (B, C, 14, 14), dtype=jnp.float32)
    y2 = jax.block_until_ready(layer_normalization_4d(x2, g_r, b_r, eps=1e-5))
    assert jnp.allclose(y2, _reference(x2, g_r, b_r, 1e-5), atol=1e-5, rtol=1e-5), \
        "mismatch vs reference (ragged S)"

    # Odd batch: no clean sublane fold -> exercises the plain (unfolded) kernel path.
    x4 = jax.random.normal(jax.random.PRNGKey(2), (3, C, 16, 16), dtype=jnp.float32)
    y4 = jax.block_until_ready(layer_normalization_4d(x4, g_r, b_r, eps=1e-5))
    assert jnp.allclose(y4, _reference(x4, g_r, b_r, 1e-5), atol=1e-5, rtol=1e-5), \
        "mismatch vs reference (plain path)"

    print("KERNEL_OK")
</pallas_src>

<mosaic_0001>
module attributes {stable_mosaic.version = 11 : i64} {
  func.func @_ln4d_folded_kernel(%arg0: i32, %arg1: i32, %arg2: memref<1x8x128xf32, #tpu.memory_space<vmem>>, %arg3: memref<8x8xf32, #tpu.memory_space<vmem>>, %arg4: memref<8x1xf32, #tpu.memory_space<vmem>>, %arg5: memref<8x1xf32, #tpu.memory_space<vmem>>, %arg6: memref<1x8x128xf32, #tpu.memory_space<vmem>>) attributes {dimension_semantics = [#tpu.dimension_semantics<parallel>, #tpu.dimension_semantics<parallel>], iteration_bounds = array<i64: 1, 2>, scalar_prefetch = 0 : i64, scratch_operands = 0 : i64, tpu.core_type = #tpu.core_type<tc>, window_params = [{transform_indices = @transform_0, window_bounds = array<i64: 1, 8, 128>}, {pipeline_mode = #tpu.pipeline_mode<synchronous>, transform_indices = @transform_1, window_bounds = array<i64: 8, 8>}, {pipeline_mode = #tpu.pipeline_mode<synchronous>, transform_indices = @transform_2, window_bounds = array<i64: 8, 1>}, {pipeline_mode = #tpu.pipeline_mode<synchronous>, transform_indices = @transform_3, window_bounds = array<i64: 8, 1>}, {transform_indices = @transform_4, window_bounds = array<i64: 1, 8, 128>}]} {
    %c0 = arith.constant 0 : index
    %c0_0 = arith.constant 0 : index
    %c0_1 = arith.constant 0 : index
    %0 = vector.load %arg2[%c0, %c0_0, %c0_1] : memref<1x8x128xf32, #tpu.memory_space<vmem>>, vector<1x8x128xf32>
    %1 = vector.shape_cast %0 : vector<1x8x128xf32> to vector<8x128xf32>
    %c0_2 = arith.constant 0 : index
    %c0_3 = arith.constant 0 : index
    %2 = vector.load %arg3[%c0_2, %c0_3] : memref<8x8xf32, #tpu.memory_space<vmem>>, vector<8x8xf32>
    %cst = arith.constant dense<0.000000e+00> : vector<8x128xf32>
    %3 = tpu.matmul %2, %1, %cst {dimension_numbers = #tpu.dot_dimension_numbers<[1], [0], [0], [1], [0, 0, 1, 1], [], []>, precision = #tpu.contract_precision<fp32>} : vector<8x8xf32>, vector<8x128xf32>, vector<8x128xf32> -> vector<8x128xf32>
    %cst_4 = arith.constant 2.500000e-01 : f32
    %4 = vector.broadcast %cst_4 : f32 to vector<8x128xf32>
    %5 = arith.mulf %3, %4 : vector<8x128xf32>
    %6 = arith.subf %1, %5 : vector<8x128xf32>
    %7 = arith.mulf %6, %6 : vector<8x128xf32>
    %cst_5 = arith.constant dense<0.000000e+00> : vector<8x128xf32>
    %8 = tpu.matmul %2, %7, %cst_5 {dimension_numbers = #tpu.dot_dimension_numbers<[1], [0], [0], [1], [0, 0, 1, 1], [], []>, precision = #tpu.contract_precision<fp32>} : vector<8x8xf32>, vector<8x128xf32>, vector<8x128xf32> -> vector<8x128xf32>
    %cst_6 = arith.constant 2.500000e-01 : f32
    %9 = vector.broadcast %cst_6 : f32 to vector<8x128xf32>
    %10 = arith.mulf %8, %9 : vector<8x128xf32>
    %cst_7 = arith.constant 9.99999974E-6 : f32
    %11 = vector.broadcast %cst_7 : f32 to vector<8x128xf32>
    %12 = arith.addf %10, %11 : vector<8x128xf32>
    %13 = math.rsqrt %12 : vector<8x128xf32>
    %14 = arith.mulf %6, %13 : vector<8x128xf32>
    %c0_8 = arith.constant 0 : index
    %c0_9 = arith.constant 0 : index
    %15 = vector.load %arg4[%c0_8, %c0_9] : memref<8x1xf32, #tpu.memory_space<vmem>>, vector<8x1xf32>
    %16 = vector.broadcast %15 : vector<8x1xf32> to vector<8x128xf32>
    %17 = arith.mulf %14, %16 : vector<8x128xf32>
    %c0_10 = arith.constant 0 : index
    %c0_11 = arith.constant 0 : index
    %18 = vector.load %arg5[%c0_10, %c0_11] : memref<8x1xf32, #tpu.memory_space<vmem>>, vector<8x1xf32>
    %19 = vector.broadcast %18 : vector<8x1xf32> to vector<8x128xf32>
    %20 = arith.addf %17, %19 : vector<8x128xf32>
    %21 = vector.shape_cast %20 : vector<8x128xf32> to vector<1x8x128xf32>
    %c0_12 = arith.constant 0 : index
    %c0_13 = arith.constant 0 : index
    %c0_14 = arith.constant 0 : index
    %22 = vector.load %arg6[%c0_12, %c0_13, %c0_14] : memref<1x8x128xf32, #tpu.memory_space<vmem>>, vector<1x8x128xf32>
    tpu.vector_store %arg6[%c0_12, %c0_13, %c0_14], %21 {strides = array<i32>} : memref<1x8x128xf32, #tpu.memory_space<vmem>>, vector<1x8x128xf32>,
    return
  }
  func.func @transform_0(%arg0: i32, %arg1: i32) -> (i32, i32, i32) {
    %c0_i32 = arith.constant 0 : i32
    %c0_i32_0 = arith.constant 0 : i32
    return %arg0, %c0_i32, %arg1 : i32, i32, i32
  }
  func.func @transform_1(%arg0: i32, %arg1: i32) -> (i32, i32) {
    %c0_i32 = arith.constant 0 : i32
    %c0_i32_0 = arith.constant 0 : i32
    %c0_i32_1 = arith.constant 0 : i32
    return %c0_i32, %c0_i32_0 : i32, i32
  }
  func.func @transform_2(%arg0: i32, %arg1: i32) -> (i32, i32) {
    %c0_i32 = arith.constant 0 : i32
    %c0_i32_0 = arith.constant 0 : i32
    %c0_i32_1 = arith.constant 0 : i32
    return %c0_i32, %c0_i32_0 : i32, i32
  }
  func.func @transform_3(%arg0: i32, %arg1: i32) -> (i32, i32) {
    %c0_i32 = arith.constant 0 : i32
    %c0_i32_0 = arith.constant 0 : i32
    %c0_i32_1 = arith.constant 0 : i32
    return %c0_i32, %c0_i32_0 : i32, i32
  }
  func.func @transform_4(%arg0: i32, %arg1: i32) -> (i32, i32, i32) {
    %c0_i32 = arith.constant 0 : i32
    %c0_i32_0 = arith.constant 0 : i32
    return %arg0, %c0_i32, %arg1 : i32, i32, i32
  }
}

</mosaic_0001>

<bundles_post_ra>
// kernel: tpu_custom_call.1
= control target key start
LH: loop header
LB: loop body
LE: loop exit
PB: predicated region body
PF: predicated region fallthrough
CT: control target
= control target key end

     0   :  { %9 = vsyncpa [#allocation3], 0  ;;  %s1746_s0 = inlined_call_operand.vmem [shape: f32[1,8,256], index: 0, kind: input, shape index: {}]   ;;  %s1747_s1 = inlined_call_operand.hbm [shape: f32[8,8], index: 1, kind: input, shape index: {}]   ;;  %s1748_s2 = inlined_call_operand.vmem [shape: f32[8,1], index: 2, kind: input, shape index: {}]   ;;  %s1749_s3 = inlined_call_operand.vmem [shape: f32[8,1], index: 3, kind: input, shape index: {}]   ;;  %s1750_s4 = inlined_call_operand.hbm [shape: f32[1,8,256], index: 4, kind: output, shape index: {}]  }
   0x1   :  { %10 = vsyncpa [#allocation4], 0 }
   0x2   :  { %12 = vsyncpa [#allocation4 + $0x1], 0  ;;  %s1564_s15 = smov 0   ;;  %s1566_s16 = smov 0  }
   0x3   :  { %s1568_s17 = smov 0   ;;  %s1570_s18 = smov 0  }
   0x4   :  { %s1572_s19 = smov 0   ;;  %s1574_s20 = smov 0  }
   0x5 LB: > { %s1257_s21 = sadd.s32 4294967295, %s1532_s20   ;;  %s1258_s22 = sadd.s32 4294967294, %s1532_s20   ;;  %s1532_s20 = sphi %s1574_s20, %s18_s20   ;;  %s1528_s19 = sphi %s1572_s19, %s1759_s19   ;;  %s1524_s18 = sphi %s1570_s18, %s1758_s18   ;;  %s1520_s17 = sphi %s1568_s17, %s1757_s17   ;;  %s1516_s16 = sphi %s1566_s16, %s1756_s16   ;;  %s1512_s15 = sphi %s1564_s15, %s1755_s15  }
   0x6   : > { %s27_s23 = sadd.s32 1, %s1528_s19  ;;  %s130_s24 = sadd.s32 1, %s1520_s17 }
   0x7   : > { %p28_p0 = scmp.ge.s32.totalorder %s27_s23, 2  ;;  %p140_p1 = scmp.ne.s32.totalorder %s1520_s17, %s1516_s16 }
   0x8   : > { %p141_p2 = scmp.eq.s32.totalorder %s1257_s21, 1  ;;  %p146_p3 = scmp.ne.s32.totalorder %s1516_s16, %s1512_s15 }
   0x9   : > { %s1761_s23 = smov (%p28_p0, %s27_s23), 0  ;;  %p147_p5 = scmp.eq.s32.totalorder %s1258_s22, 1 }
   0xa   : > { %p1604_p4 = por %p141_p2, %p140_p1  ;;  %s126_s26 = ssub.s32 %s1528_s19, %s1761_s23 }
   0xb   : > { %p1259_p6 = scmp.ge.s32.totalorder %s1532_s20, 1  ;;  %p128_p7 = scmp.eq.s32.totalorder %s126_s26, 0 }
   0xc   : > { %p1611_p8 = por %p147_p5, %p146_p3  ;;  %p154_p9 = scmp.lt.s32.totalorder %s1532_s20, 3 }
   0xd   : > { %s1617_s28 = scalar_select %p128_p7, %s1520_s17, %s130_s24  }
   0xe   : > { %p1619_p10 = pnand %p1259_p6, %p154_p9  ;;  %p1623_p11 = scmp.eq.s32.totalorder %s1257_s21, 0 }
   0xf   : > { %s1534_s5 = smov [#allocation2]  }
  0x10   : > { %p1360_p12 = pneg %p1619_p10  ;;  %s167_s6 = sshll.u32 %s1534_s5, 4  ;;  %s168_s6 = int_to_ptr.vmem [resolvable:$true] %s167_s6 }
  0x11   : > { %s1437_s7 = scalar_lea.vmem %s168_s6, 128  ;;  %p1445_p5 = scmp.lt.s32.totalorder %s168_s6, %s168_s6 }
  0x12   : > { %p1361_p13 = pnand %p1623_p11, %p1360_p12  ;;  %p1438_p1 = scmp.ne.s32.totalorder %s168_s6, %s1437_s7 }
  0x13   : > { %p1446_p6 = scmp.lt.s32.totalorder %s1437_s7, %s1437_s7 }
  0x14   : > { %p1428_p0 = pneg %p1361_p13 }
  0x15   : > { %p1447_p7 = por %p1446_p6, %p1445_p5 }
  0x16   : > { %p1440_p2 = pnand %p1438_p1, %p1428_p0 }
  0x18   : > { %p1441_p3 = pneg %p1440_p2 }
  0x1a   : > { %p1448_p9 = pnand %p1447_p7, %p1441_p3 }
  0x1c   : > { %1451 = shalt.err (!%p1448_p9)
}
  0x1d   : > { %1363 = dma.hbm_to_vmem [thread:$0]  (!%p1361_p13), %s1747_s1, 128, %s168_s6, [#allocation3]  }
  0x1e   : > { %197 = sbr.rel (%p1619_p10) target bundleno = 514 (0x202), region = 36 }
  0x23   : > { %1503 = dma.done.wait (%p1623_p11), [#allocation3], 128  }
  0x24   : > { %1505 = vsyncadd (%p1623_p11), [#allocation3], 4294967168  ;;  %p228_p12 = scmp.lt.s32.totalorder %s1524_s18, 1  ;;  %v1535_v0 = vmov 0.0   ;;  %vm1536_vm0 = vmmov 0   ;;  %vm236_vm1 = vcmask 64512  }
  0x25   : > { %1294 = vmatprep.subr.mxu0 %v1535_v0  ;;  %1299 = vmatprep.subr.mxu1 %v1535_v0  ;;  %v235_v2 = vld [vmem:[#allocation2] sm:$0xff]  ;;  %v1537_v15 = vmov 0   ;;  %s223_s29 = sand.u32 1, %s1516_s16   ;;  %s1267_s5 = sshll.u32 %s1524_s18, 7 }
  0x26   : > { %s229_s10 = scalar_select %p228_p12, %s1524_s18, 1  ;;  %1296 = vmatprep.mubr.msk.f32.mxu0 %vm1536_vm0, %v1535_v0  ;;  %1301 = vmatprep.mubr.msk.f32.mxu1 %vm1536_vm0, %v1535_v0  ;;  %v238_v4 = vsel %vm236_vm1, %v235_v2, 0  ;;  %v1139_v14 = vld [vmem:[%s1748_s2] sm:$0xff] }
  0x27   : > { %v1651_v5 = vand.u32 4294901760, %v238_v4  ;;  %1423 = vset.pattern.permute.xlu0 %v1537_v15  ;;  %v1146_v16 = vld [vmem:[%s1749_s3] sm:$0xff]  ;;  %s1264_s30 = sshll.u32 %s223_s29, 3  ;;  %s1538_s13 = smov [#allocation5]  }
  0x28   : > { %s1265_s11 = sshll.u32 %s229_s10, 3  ;;  %1142 = vperm.xlu0 %1423, %v1139_v14   ;;  %s225_s6 = scalar_lea.vmem [#allocation5], %s1264_s30 }
  0x29   : > { %s233_s14 = scalar_lea.vmem %s1746_s0, %s1265_s11  ;;  %v1654_v7 = vsub.f32 %v238_v4, %v1651_v5  ;;  %s1170_s7 = sshll.u32 %s225_s6, 4  ;;  %s1171_s7 = int_to_ptr.vmem [resolvable:$true] %s1170_s7 }
  0x2a   : > { %v234_v1 = vld [vmem:[%s233_s14] sm:$0xff]  ;;  %s1168_s10 = scalar_lea.hbm %s1750_s4, %s1267_s5  ;;  %s1155_s11 = scalar_lea.sflag [#allocation4], %s223_s29 }
  0x2b   : > { %v271_v3 = vand.u32 4294901760, %v234_v1  ;;  %v1658_v9 = vand.u32 4294901760, %v1654_v7  ;;  %s1452_s12 = scalar_lea.vmem %s1171_s7, 128  ;;  %s1456_s14 = sshll.u32 %s1538_s13, 4  ;;  %s1457_s14 = int_to_ptr.vmem [resolvable:$false] %s1456_s14 }
  0x2c   : > { %1149 = vperm.xlu0 %1423, %v1146_v16   ;;  %p1453_p10 = scmp.ne.s32.totalorder %s1171_s7, %s1452_s12  ;;  %s1458_s18 = scalar_lea.vmem %s1457_s14, 256 }
  0x2d   : > { %1295 = vmatpush3.msra.mxu0 %v271_v3  ;;  %v348_v6 = vsub.f32 %v234_v1, %v271_v3  ;;  %v309_v11 = vsub.f32 %v1654_v7, %v1658_v9  ;;  %p1459_p0 = scmp.lt.s32.totalorder %s1171_s7, %s1457_s14  ;;  %p1460_p1 = scmp.lt.s32.totalorder %s1458_s18, %s1452_s12 }
  0x2e   : > { %1304 = vmatprep.subr.mxu0 %v1535_v0  ;;  %p1454_p11 = pnand %p1453_p10, %p1604_p4 }
  0x2f   : > { %v349_v8 = vand.u32 4294901760, %v348_v6  ;;  %v310_v13 = vand.u32 4294901760, %v309_v11  ;;  %p1461_p2 = por %p1460_p1, %p1459_p0 }
  0x30   : > { %p1455_p13 = pneg %p1454_p11 }
  0x31   : > { %v350_v10 = vsub.f32 %v348_v6, %v349_v8  ;;  %1297 = vmatmul.mubr.f32.vlgmr.msra.gmra.mxu0 %v310_v13 }
  0x32   : > { %1305 = vmatpush3.msra.mxu0 %v348_v6  ;;  %1306 = vmatprep.mubr.msk.f32.mxu0 %vm1536_vm0, %v1535_v0  ;;  %p1462_p3 = pnand %p1461_p2, %p1455_p13 }
  0x33   : > { %v351_v12 = vand.u32 4294901760, %v350_v10  ;;  %1314 = vmatprep.subr.mxu0 %v1535_v0 }
  0x35   : > { %1300 = vmatpush3.msra.mxu1 %v351_v12  ;;  %1307 = vmatmul.mubr.f32.vlgmr.msra.gmra.mxu0 %v1654_v7 }
  0x36   : > { %1302 = vmatmul.mubr.f32.vlgmr.msra.gmra.mxu1 %v1651_v5  ;;  %1309 = vmatprep.subr.mxu1 %v1535_v0 }
  0x37   : > { %1310 = vmatpush3.msra.mxu1 %v271_v3  ;;  %1311 = vmatprep.mubr.msk.f32.mxu1 %vm1536_vm0, %v1535_v0 }
  0x38   : > { %1319 = vmatprep.subr.mxu1 %v1535_v0  ;;  %1315 = vmatpush3.msra.mxu0 %v349_v8 }
  0x39   : > { %1316 = vmatprep.mubr.msk.f32.mxu0 %vm1536_vm0, %v1535_v0  ;;  %1324 = vmatprep.subr.mxu0 %v1535_v0 }
  0x3a   : > { %1312 = vmatmul.mubr.f32.vlgmr.msra.gmra.mxu1 %v1658_v9  ;;  %1317 = vmatmul.mubr.f32.vlgmr.msra.gmra.mxu0 %v1651_v5 }
  0x3b   : > { %1320 = vmatpush3.msra.mxu1 %v271_v3  ;;  %1321 = vmatprep.mubr.msk.f32.mxu1 %vm1536_vm0, %v1535_v0 }
  0x3c   : > { %1326 = vmatprep.mubr.msk.f32.mxu0 %vm1536_vm0, %v1535_v0  ;;  %1329 = vmatprep.subr.mxu1 %v1535_v0 }
  0x3e   : > { %1322 = vmatmul.mubr.f32.vlgmr.msra.gmra.mxu1 %v1651_v5 }
  0x3f   : > { %1331 = vmatprep.mubr.msk.f32.mxu1 %vm1536_vm0, %v1535_v0 }
  0xa3   : > { %v1143_v61 = vpop.permute.xlu0 %1142 }
  0xf1   : > { %v312_v17 = vpop.f32.mrf.mxu0 }
  0xf3   : > { %v1298_v19 = vpop.f32.mrf.mxu0 }
  0xf5   : > { %v462_v22 = vpop.f32.mrf.mxu0 }
  0xf6   : > { %v388_v18 = vpop.f32.mrf.mxu1 }
  0xf7   : > { %v389_v21 = vadd.f32 %v388_v18, %v312_v17  ;;  %v1308_v25 = vpop.f32.mrf.mxu0 }
  0xf8   : > { %v1303_v20 = vpop.f32.mrf.mxu1 }
  0xf9   : > { %v463_v24 = vadd.f32 %v462_v22, %v389_v21 }
  0xfa   : > { %v536_v23 = vpop.f32.mrf.mxu1  ;;  %v610_v28 = vpop.f32.mrf.mxu0 }
  0xfb   : > { %v537_v27 = vadd.f32 %v536_v23, %v463_v24 }
  0xfc   : > { %v1313_v26 = vpop.f32.mrf.mxu1  ;;  %v1318_v31 = vpop.f32.mrf.mxu0 }
  0xfd   : > { %v611_v30 = vadd.f32 %v610_v28, %v537_v27 }
  0xfe   : > { %v682_v29 = vpop.f32.mrf.mxu1 }
  0xff   : > { %v683_v33 = vadd.f32 %v682_v29, %v611_v30 }
 0x100   : > { %v1323_v32 = vpop.f32.mrf.mxu1 }
 0x101   : > { %v686_v34 = vmul.f32 0.25, %v683_v33 }
 0x103   : > { %v687_v35 = vsub.f32 %v234_v1, %v686_v34  ;;  %v1150_v1 = vpop.permute.xlu0 %1149 }
 0x105   : > { %v688_v36 = vmul.f32 %v687_v35, %v687_v35 }
 0x107   : > { %v720_v37 = vand.u32 4294901760, %v688_v36 }
 0x109   : > { %v797_v38 = vsub.f32 %v688_v36, %v720_v37  ;;  %1325 = vmatpush3.msra.mxu0 %v720_v37 }
 0x10a   : > { %1327 = vmatmul.mubr.f32.vlgmr.msra.gmra.mxu0 %v310_v13  ;;  %1334 = vmatprep.subr.mxu0 %v1535_v0 }
 0x10b   : > { %1335 = vmatpush3.msra.mxu0 %v797_v38  ;;  %1336 = vmatprep.mubr.msk.f32.mxu0 %vm1536_vm0, %v1535_v0  ;;  %v798_v39 = vand.u32 4294901760, %v797_v38 }
 0x10c   : > { %1344 = vmatprep.subr.mxu0 %v1535_v0 }
 0x10d   : > { %v799_v40 = vsub.f32 %v797_v38, %v798_v39 }
 0x10e   : > { %1337 = vmatmul.mubr.f32.vlgmr.msra.gmra.mxu0 %v1654_v7 }
 0x10f   : > { %1345 = vmatpush3.msra.mxu0 %v798_v39  ;;  %v800_v41 = vand.u32 4294901760, %v799_v40  ;;  %1346 = vmatprep.mubr.msk.f32.mxu0 %vm1536_vm0, %v1535_v0 }
 0x111   : > { %1330 = vmatpush3.msra.mxu1 %v800_v41 }
 0x112   : > { %1332 = vmatmul.mubr.f32.vlgmr.msra.gmra.mxu1 %v1651_v5  ;;  %1339 = vmatprep.subr.mxu1 %v1535_v0 }
 0x113   : > { %1340 = vmatpush3.msra.mxu1 %v720_v37  ;;  %1341 = vmatprep.mubr.msk.f32.mxu1 %vm1536_vm0, %v1535_v0 }
 0x114   : > { %1349 = vmatprep.subr.mxu1 %v1535_v0  ;;  %1347 = vmatmul.mubr.f32.vlgmr.msra.gmra.mxu0 %v1651_v5 }
 0x116   : > { %1342 = vmatmul.mubr.f32.vlgmr.msra.gmra.mxu1 %v1658_v9 }
 0x117   : > { %1350 = vmatpush3.msra.mxu1 %v720_v37  ;;  %1351 = vmatprep.mubr.msk.f32.mxu1 %vm1536_vm0, %v1535_v0 }
 0x11a   : > { %1352 = vmatmul.mubr.f32.vlgmr.msra.gmra.mxu1 %v1651_v5 }
 0x1ca   : > { %v761_v42 = vpop.f32.mrf.mxu0 }
 0x1cc   : > { %v1328_v43 = vpop.f32.mrf.mxu0 }
 0x1ce   : > { %v911_v44 = vpop.f32.mrf.mxu0 }
 0x1d0   : > { %v1338_v45 = vpop.f32.mrf.mxu0 }
 0x1d2   : > { %v837_v46 = vpop.f32.mrf.mxu1 }
 0x1d3   : > { %v838_v47 = vadd.f32 %v837_v46, %v761_v42 }
 0x1d4   : > { %v1333_v48 = vpop.f32.mrf.mxu1  ;;  %v1059_v49 = vpop.f32.mrf.mxu0 }
 0x1d5   : > { %v912_v50 = vadd.f32 %v911_v44, %v838_v47 }
 0x1d6   : > { %v985_v51 = vpop.f32.mrf.mxu1  ;;  %v1348_v52 = vpop.f32.mrf.mxu0 }
 0x1d7   : > { %v986_v53 = vadd.f32 %v985_v51, %v912_v50 }
 0x1d8   : > { %v1343_v54 = vpop.f32.mrf.mxu1 }
 0x1d9   : > { %v1060_v55 = vadd.f32 %v1059_v49, %v986_v53 }
 0x1da   : > { %v1131_v56 = vpop.f32.mrf.mxu1 }
 0x1db   : > { %v1132_v57 = vadd.f32 %v1131_v56, %v1060_v55 }
 0x1dc   : > { %v1353_v58 = vpop.f32.mrf.mxu1 }
 0x1dd   : > { %v1135_v59 = vmul.f32 0.25, %v1132_v57 }
 0x1df   : > { %v1136_v60 = vadd.f32 1e-05, %v1135_v59 }
 0x1e1   : > { %1424 = vrsqrt.f32 %v1136_v60 }
 0x1ee   : > { %v1425_v62 = vpop.eup %1424 }
 0x1ef   : > { %v1138_v63 = vmul.f32 %v1425_v62, %v687_v35 }
 0x1f1   : > { %v1145_v0 = vmul.f32 %v1143_v61, %v1138_v63 }
 0x1f3   : > { %v1152_v2 = vadd.f32 %v1150_v1, %v1145_v0 }
 0x1f5   : > { %1153 = vst [vmem:[%s225_s6] sm:$0xff] %v1152_v2 }
 0x1f6   : > { %1465 = shalt.err (!%p1462_p3)
}
 0x1f7   : > { %s1466_s21 = scalar_lea.hbm %s1168_s10, 128  ;;  %s1470_s26 = scalar_lea.hbm %s1750_s4, 256 }
 0x1f8   : > { %p1467_p5 = scmp.ne.s32.totalorder %s1168_s10, %s1466_s21  ;;  %p1471_p9 = scmp.lt.s32.totalorder %s1168_s10, %s1750_s4 }
 0x1f9   : > { %p1472_p12 = scmp.lt.s32.totalorder %s1470_s26, %s1466_s21 }
 0x1fa   : > { %p1468_p6 = pnand %p1467_p5, %p1604_p4 }
 0x1fb   : > { %p1473_p10 = por %p1472_p12, %p1471_p9 }
 0x1fc   : > { %p1469_p7 = pneg %p1468_p6 }
 0x1fe   : > { %p1474_p11 = pnand %p1473_p10, %p1469_p7 }
 0x200   : > { %1477 = shalt.err (!%p1474_p11)
}
 0x201   : > { %1358 = dma.vmem_to_hbm [thread:$0]  (%p1604_p4), %s1171_s7, 128, %s1168_s10, %s1155_s11  }
 0x202 PF: > { %p1370_p13 = scmp.ge.s32.totalorder %s1532_s20, 2  ;;  %s1182_s5 = sand.u32 1, %s1512_s15  }
 0x203   : > { %s1183_s6 = scalar_lea.sflag [#allocation4], %s1182_s5 }
 0x204   : > { %p1365_p0 = pnand %p1370_p13, %p1611_p8 }
 0x206   : > { %p1366_p1 = pneg %p1365_p0 }
 0x208   : > { %1507 = dma.done.wait (%p1366_p1), %s1183_s6, 128  }
 0x209   : > { %1509 = vsyncadd (%p1366_p1), %s1183_s6, 4294967168  ;;  %s18_s20 = sadd.s32 1, %s1532_s20   ;;  %s1755_s15 = smov %s1516_s16 }
 0x20a   : > { %p15_p2 = scmp.ge.s32.totalorder %s18_s20, 4   ;;  %s1756_s16 = smov %s1520_s17 }
 0x20b   : > { %s1757_s17 = smov %s1617_s28  ;;  %s1758_s18 = smov %s1528_s19 }
 0x20c   : > { %s1759_s19 = smov %s1761_s23  ;;  %17 = sbr.rel (!%p15_p2) target bundleno = 5 (0x5), region = 76 }
 0x211   :  { %1188 = vsyncpa [#allocation3], 1 }
 0x212   :  { %1190 = vsyncpa [#allocation3 + $0x1], 1 }
 0x213   :  { %1191 = vsyncpa [#allocation4], 1 }
 0x214   :  { %1193 = vsyncpa [#allocation4 + $0x1], 1 }

</bundles_post_ra>
